<compile_context>
chip_gen: v7x
topology: tpu7x:2x2x1
jax: 0.10.0
libtpu: 0.0.40
codegen_flags: <defaults>
</compile_context>

<pallas_src>
import jax
import jax.numpy as jnp
from jax import lax
from jax.experimental import pallas as pl
from jax.experimental.pallas import tpu as pltpu
import numpy as np

N = 2            # batch (example)
L = 8            # sequence length
H = 32           # rnn_hidden_size
OUT = 5          # mitbih -> 5 classes
OUT_PAD = 128    # lane-dense padded output width
NEG_SLOPE = 0.01 # F.leaky_relu default


def lstm_head_kernel(x_ref, w_ih_ref, w_hhT_ref, b_ref, fc_wT_ref, fc_b_ref, out_ref):
    """Full forward pass for one batch tile: LSTM over time -> leaky_relu(h_N) -> Linear.

    x_ref    : (TM, L)        f32 input signal (feature dim of 1 folded in)
    w_ih_ref : (1, 4H)        f32 input-to-hidden weights, g-gate lanes pre-scaled by 2
    w_hhT_ref: (H, 4H)        bf16 hidden-to-hidden weights W_hh^T, g-gate cols pre-scaled by 2
    b_ref    : (1, 4H)        f32 (b_ih + b_hh), g-gate lanes pre-scaled by 2
    fc_wT_ref: (H, OUT_PAD)   bf16 fc weight, pre-transposed + zero-padded to 128 lanes
    fc_b_ref : (1, OUT_PAD)   f32 fc bias, zero-padded
    out_ref  : (TM, OUT_PAD)  f32
    """
    tm = x_ref.shape[0]
    seq = x_ref.shape[1]

    x = x_ref[...]            # (TM, L)
    w_ih = w_ih_ref[...]      # (1, 4H)
    w_hhT = w_hhT_ref[...]    # (H, 4H) bf16
    b = b_ref[...]            # (1, 4H)

    h = jnp.zeros((tm, H), jnp.float32)
    c = jnp.zeros((tm, H), jnp.float32)

    # Fully unrolled time recurrence (L is compile-time static): gives the LLO scheduler
    # cross-iteration visibility.  The input contribution x_t*W_ih + b is computed
    # in-loop at its point of use: it does not depend on (h, c) so it still overlaps the
    # previous step's recurrent matmul, but the per-step live set stays O(TM*4H) instead
    # of L*TM*4H vregs (the vreg file is only 64 x 4 KiB on every generation).
    for t in range(seq):
        gates = (x[:, t:t + 1] * w_ih + b
                 + jnp.dot(h.astype(jnp.bfloat16), w_hhT,
                           preferred_element_type=jnp.float32))     # (TM, 4H) f32

        # Single full-vreg EUP op per step.  The g-gate pre-activations were pre-scaled
        # by 2 in the wrapper, so tanh(g_pre) = 2*sigmoid(2*g_pre) - 1 = 2*s_g - 1 and
        # i/f/o come straight out of the same sigmoid (PyTorch gate order i, f, g, o).
        s = jax.nn.sigmoid(gates)
        i_g = s[:, 0 * H:1 * H]
        f_g = s[:, 1 * H:2 * H]
        g_g = 2.0 * s[:, 2 * H:3 * H] - 1.0
        o_g = s[:, 3 * H:4 * H]

        c = f_g * c + i_g * g_g
        h = o_g * jnp.tanh(c)        # (TM, H) EUP tanh

    # F.leaky_relu on the final hidden state.
    h_act = jnp.where(h > 0, h, NEG_SLOPE * h)

    # fc: (TM, H) @ (H, OUT_PAD) + bias  (lane-dense, unmasked vst).
    out_ref[...] = (jnp.dot(h_act.astype(jnp.bfloat16), fc_wT_ref[...],
                            preferred_element_type=jnp.float32)
                    + fc_b_ref[...])


def rnn_forward(x, params, tm_max=256):
    """x: (N, L, 1) float32, batch_first like the PyTorch module.

    tm_max: batch tile rows per grid step.  VMEM is a non-issue for this kernel
            (weights + tiles + double buffers << 1 MiB on every generation); the real
            limiter is vreg pressure in the unrolled recurrence, which is identical
            (64 vregs) on v5e/v6e/v7x.  Sweep {128, 256, 512} on real batches.
    """
    w_ih, w_hh, b_ih, b_hh, fc_w, fc_b = params
    n, l, _ = x.shape
    x2d = x.reshape(n, l).astype(jnp.float32)          # fold feature dim of size 1

    # Pad batch to a multiple of 8 sublanes and pick a batch tile TM.
    n_pad8 = ((n + 7) // 8) * 8
    tm = min(tm_max, n_pad8)
    # v7x has 2 TensorCores per chip: make sure the "parallel" batch axis has >= 2 grid
    # steps whenever the (8-padded) batch allows it, so both cores get work.
    if n_pad8 // tm < 2 and n_pad8 >= 16:
        tm = max(8, ((n_pad8 // 2) // 8) * 8)
    n_pad = ((n_pad8 + tm - 1) // tm) * tm
    if n_pad != n:
        x2d = jnp.pad(x2d, ((0, n_pad - n), (0, 0)))

    # Fold the tanh(x) = 2*sigmoid(2x) - 1 pre-scaling (factor 2 on the g-gate rows,
    # PyTorch gate order i, f, g, o) into the weights/bias so the kernel needs only ONE
    # sigmoid over the full (TM, 4H) gates vector per step.
    gate_scale = jnp.concatenate(
        [jnp.ones((2 * H,)), 2.0 * jnp.ones((H,)), jnp.ones((H,))]).astype(jnp.float32)
    w_ih_row = (w_ih.reshape(4 * H) * gate_scale).reshape(1, 4 * H)      # (1, 4H) f32
    b = ((b_ih + b_hh) * gate_scale).reshape(1, 4 * H)                   # (1, 4H) f32

    # bf16 MXU operands (weights pre-cast here, activations cast in-kernel); accumulation
    # stays f32 via preferred_element_type.  The MXU is bf16-native on all generations —
    # only v5e's VPU/EUP lack bf16, which is irrelevant here.
    w_hhT = (w_hh * gate_scale[:, None]).T.astype(jnp.bfloat16)          # (H, 4H) bf16
    # Lane-dense output: pad OUT=5 up to 128 with zero weight/bias columns.
    fc_wT_pad = (jnp.zeros((H, OUT_PAD), jnp.float32)
                 .at[:, :OUT].set(fc_w.T).astype(jnp.bfloat16))          # (H, 128) bf16
    fc_b_pad = jnp.zeros((1, OUT_PAD), jnp.float32).at[0, :OUT].set(fc_b)

    grid = (n_pad // tm,)

    def full(shape):
        return pl.BlockSpec(shape, lambda i: (0, 0))

    out = pl.pallas_call(
        lstm_head_kernel,
        out_shape=jax.ShapeDtypeStruct((n_pad, OUT_PAD), jnp.float32),
        grid=grid,
        in_specs=[
            pl.BlockSpec((tm, l), lambda i: (i, 0)),   # x tile per grid step
            full((1, 4 * H)),                          # w_ih (untiled)
            full((H, 4 * H)),                          # w_hh^T (untiled, bf16)
            full((1, 4 * H)),                          # bias (untiled)
            full((H, OUT_PAD)),                        # fc weight^T (untiled, bf16)
            full((1, OUT_PAD)),                        # fc bias (untiled)
        ],
        out_specs=pl.BlockSpec((tm, OUT_PAD), lambda i: (i, 0)),
        compiler_params=pltpu.CompilerParams(
            dimension_semantics=("parallel",)),        # megacore sharding on v7x
    )(x2d, w_ih_row, w_hhT, b, fc_wT_pad, fc_b_pad)

    return out[:n, :OUT]


def rnn_forward_ref(x, params):
    """Pure-JAX reference (mirrors torch.nn.LSTM + leaky_relu + Linear), all f32."""
    w_ih, w_hh, b_ih, b_hh, fc_w, fc_b = params
    n, l, _ = x.shape

    def step(carry, x_t):
        h, c = carry
        gates = x_t @ w_ih.T + h @ w_hh.T + b_ih + b_hh
        i = jax.nn.sigmoid(gates[:, 0 * H:1 * H])
        f = jax.nn.sigmoid(gates[:, 1 * H:2 * H])
        g = jnp.tanh(gates[:, 2 * H:3 * H])
        o = jax.nn.sigmoid(gates[:, 3 * H:4 * H])
        c_new = f * c + i * g
        h_new = o * jnp.tanh(c_new)
        return (h_new, c_new), None

    h0 = jnp.zeros((n, H), jnp.float32)
    c0 = jnp.zeros((n, H), jnp.float32)
    (h_last, _), _ = lax.scan(step, (h0, c0), jnp.swapaxes(x, 0, 1))
    h_act = jnp.where(h_last > 0, h_last, NEG_SLOPE * h_last)
    return h_act @ fc_w.T + fc_b


def init_params(key):
    """Deterministic init matching PyTorch shapes (uniform(-1/sqrt(H), 1/sqrt(H)))."""
    ks = jax.random.split(key, 6)
    bound = 1.0 / np.sqrt(H)
    u = lambda k, shape: jax.random.uniform(k, shape, jnp.float32, -bound, bound)
    w_ih = u(ks[0], (4 * H, 1))     # nn.LSTM weight_ih_l0
    w_hh = u(ks[1], (4 * H, H))     # nn.LSTM weight_hh_l0
    b_ih = u(ks[2], (4 * H,))
    b_hh = u(ks[3], (4 * H,))
    fc_bound = 1.0 / np.sqrt(H)     # nn.Linear(H, OUT)
    fc_w = jax.random.uniform(ks[4], (OUT, H), jnp.float32, -fc_bound, fc_bound)
    fc_b = jax.random.uniform(ks[5], (OUT,), jnp.float32, -fc_bound, fc_bound)
    return (w_ih, w_hh, b_ih, b_hh, fc_w, fc_b)


if __name__ == "__main__":
    key = jax.random.PRNGKey(0)
    k_x, k_p = jax.random.split(key)
    x = jax.random.normal(k_x, (N, L, 1), jnp.float32)
    params = init_params(k_p)

    out = jax.block_until_ready(rnn_forward(x, params))
    ref = jax.block_until_ready(rnn_forward_ref(x, params))

    # Tolerance relaxed vs the pure-f32 version because the MXU operands are bf16
    # (accumulation is still f32).
    np.testing.assert_allclose(np.asarray(out), np.asarray(ref), rtol=2e-2, atol=2e-2)

    assert out.shape == (N, OUT)
    print("KERNEL_OK")
</pallas_src>

<mosaic_0001>
module attributes {stable_mosaic.version = 11 : i64} {
  func.func @lstm_head_kernel(%arg0: i32, %arg1: memref<8x8xf32, #tpu.memory_space<vmem>>, %arg2: memref<1x128xf32, #tpu.memory_space<vmem>>, %arg3: memref<32x128xbf16, #tpu.memory_space<vmem>>, %arg4: memref<1x128xf32, #tpu.memory_space<vmem>>, %arg5: memref<32x128xbf16, #tpu.memory_space<vmem>>, %arg6: memref<1x128xf32, #tpu.memory_space<vmem>>, %arg7: memref<8x128xf32, #tpu.memory_space<vmem>>) attributes {dimension_semantics = [#tpu.dimension_semantics<parallel>], iteration_bounds = array<i64: 1>, scalar_prefetch = 0 : i64, scratch_operands = 0 : i64, tpu.core_type = #tpu.core_type<tc>, window_params = [{transform_indices = @transform_0, window_bounds = array<i64: 8, 8>}, {pipeline_mode = #tpu.pipeline_mode<synchronous>, transform_indices = @transform_1, window_bounds = array<i64: 1, 128>}, {pipeline_mode = #tpu.pipeline_mode<synchronous>, transform_indices = @transform_2, window_bounds = array<i64: 32, 128>}, {pipeline_mode = #tpu.pipeline_mode<synchronous>, transform_indices = @transform_3, window_bounds = array<i64: 1, 128>}, {pipeline_mode = #tpu.pipeline_mode<synchronous>, transform_indices = @transform_4, window_bounds = array<i64: 32, 128>}, {pipeline_mode = #tpu.pipeline_mode<synchronous>, transform_indices = @transform_5, window_bounds = array<i64: 1, 128>}, {transform_indices = @transform_6, window_bounds = array<i64: 8, 128>}]} {
    %c0 = arith.constant 0 : index
    %c0_0 = arith.constant 0 : index
    %0 = vector.load %arg1[%c0, %c0_0] : memref<8x8xf32, #tpu.memory_space<vmem>>, vector<8x8xf32>
    %c0_1 = arith.constant 0 : index
    %c0_2 = arith.constant 0 : index
    %1 = vector.load %arg2[%c0_1, %c0_2] : memref<1x128xf32, #tpu.memory_space<vmem>>, vector<1x128xf32>
    %c0_3 = arith.constant 0 : index
    %c0_4 = arith.constant 0 : index
    %2 = vector.load %arg3[%c0_3, %c0_4] : memref<32x128xbf16, #tpu.memory_space<vmem>>, vector<32x128xbf16>
    %c0_5 = arith.constant 0 : index
    %c0_6 = arith.constant 0 : index
    %3 = vector.load %arg4[%c0_5, %c0_6] : memref<1x128xf32, #tpu.memory_space<vmem>>, vector<1x128xf32>
    %cst = arith.constant 0.000000e+00 : f32
    %4 = vector.broadcast %cst : f32 to vector<8x32xf32>
    %cst_7 = arith.constant 0.000000e+00 : f32
    %5 = vector.broadcast %cst_7 : f32 to vector<8x32xf32>
    %6 = vector.extract_strided_slice %0 {offsets = [0, 0], sizes = [8, 1], strides = [1, 1]} : vector<8x8xf32> to vector<8x1xf32>
    %7 = vector.broadcast %6 : vector<8x1xf32> to vector<8x128xf32>
    %8 = vector.broadcast %1 : vector<1x128xf32> to vector<8x128xf32>
    %9 = arith.mulf %7, %8 : vector<8x128xf32>
    %10 = vector.broadcast %3 : vector<1x128xf32> to vector<8x128xf32>
    %11 = arith.addf %9, %10 : vector<8x128xf32>
    %12 = arith.truncf %4 : vector<8x32xf32> to vector<8x32xbf16>
    %cst_8 = arith.constant dense<0.000000e+00> : vector<8x128xf32>
    %13 = tpu.matmul %12, %2, %cst_8 {dimension_numbers = #tpu.dot_dimension_numbers<[1], [0], [0], [1], [0, 0, 1, 1], [], []>} : vector<8x32xbf16>, vector<32x128xbf16>, vector<8x128xf32> -> vector<8x128xf32>
    %14 = arith.addf %11, %13 : vector<8x128xf32>
    %15 = arith.negf %14 : vector<8x128xf32>
    %16 = math.exp %15 : vector<8x128xf32>
    %cst_9 = arith.constant 1.000000e+00 : f32
    %17 = vector.broadcast %cst_9 : f32 to vector<8x128xf32>
    %18 = arith.addf %17, %16 : vector<8x128xf32>
    %19 = arith.divf %17, %18 : vector<8x128xf32>
    %20 = vector.extract_strided_slice %19 {offsets = [0, 0], sizes = [8, 32], strides = [1, 1]} : vector<8x128xf32> to vector<8x32xf32>
    %21 = vector.extract_strided_slice %19 {offsets = [0, 32], sizes = [8, 32], strides = [1, 1]} : vector<8x128xf32> to vector<8x32xf32>
    %22 = vector.extract_strided_slice %19 {offsets = [0, 64], sizes = [8, 32], strides = [1, 1]} : vector<8x128xf32> to vector<8x32xf32>
    %cst_10 = arith.constant 2.000000e+00 : f32
    %23 = vector.broadcast %cst_10 : f32 to vector<8x32xf32>
    %24 = arith.mulf %23, %22 : vector<8x32xf32>
    %cst_11 = arith.constant 1.000000e+00 : f32
    %25 = vector.broadcast %cst_11 : f32 to vector<8x32xf32>
    %26 = arith.subf %24, %25 : vector<8x32xf32>
    %27 = vector.extract_strided_slice %19 {offsets = [0, 96], sizes = [8, 32], strides = [1, 1]} : vector<8x128xf32> to vector<8x32xf32>
    %28 = arith.mulf %21, %5 : vector<8x32xf32>
    %29 = arith.mulf %20, %26 : vector<8x32xf32>
    %30 = arith.addf %28, %29 : vector<8x32xf32>
    %31 = math.tanh %30 : vector<8x32xf32>
    %32 = arith.mulf %27, %31 : vector<8x32xf32>
    %33 = vector.extract_strided_slice %0 {offsets = [0, 1], sizes = [8, 1], strides = [1, 1]} : vector<8x8xf32> to vector<8x1xf32>
    %34 = vector.broadcast %33 : vector<8x1xf32> to vector<8x128xf32>
    %35 = vector.broadcast %1 : vector<1x128xf32> to vector<8x128xf32>
    %36 = arith.mulf %34, %35 : vector<8x128xf32>
    %37 = vector.broadcast %3 : vector<1x128xf32> to vector<8x128xf32>
    %38 = arith.addf %36, %37 : vector<8x128xf32>
    %39 = arith.truncf %32 : vector<8x32xf32> to vector<8x32xbf16>
    %cst_12 = arith.constant dense<0.000000e+00> : vector<8x128xf32>
    %40 = tpu.matmul %39, %2, %cst_12 {dimension_numbers = #tpu.dot_dimension_numbers<[1], [0], [0], [1], [0, 0, 1, 1], [], []>} : vector<8x32xbf16>, vector<32x128xbf16>, vector<8x128xf32> -> vector<8x128xf32>
    %41 = arith.addf %38, %40 : vector<8x128xf32>
    %42 = arith.negf %41 : vector<8x128xf32>
    %43 = math.exp %42 : vector<8x128xf32>
    %cst_13 = arith.constant 1.000000e+00 : f32
    %44 = vector.broadcast %cst_13 : f32 to vector<8x128xf32>
    %45 = arith.addf %44, %43 : vector<8x128xf32>
    %46 = arith.divf %44, %45 : vector<8x128xf32>
    %47 = vector.extract_strided_slice %46 {offsets = [0, 0], sizes = [8, 32], strides = [1, 1]} : vector<8x128xf32> to vector<8x32xf32>
    %48 = vector.extract_strided_slice %46 {offsets = [0, 32], sizes = [8, 32], strides = [1, 1]} : vector<8x128xf32> to vector<8x32xf32>
    %49 = vector.extract_strided_slice %46 {offsets = [0, 64], sizes = [8, 32], strides = [1, 1]} : vector<8x128xf32> to vector<8x32xf32>
    %cst_14 = arith.constant 2.000000e+00 : f32
    %50 = vector.broadcast %cst_14 : f32 to vector<8x32xf32>
    %51 = arith.mulf %50, %49 : vector<8x32xf32>
    %cst_15 = arith.constant 1.000000e+00 : f32
    %52 = vector.broadcast %cst_15 : f32 to vector<8x32xf32>
    %53 = arith.subf %51, %52 : vector<8x32xf32>
    %54 = vector.extract_strided_slice %46 {offsets = [0, 96], sizes = [8, 32], strides = [1, 1]} : vector<8x128xf32> to vector<8x32xf32>
    %55 = arith.mulf %48, %30 : vector<8x32xf32>
    %56 = arith.mulf %47, %53 : vector<8x32xf32>
    %57 = arith.addf %55, %56 : vector<8x32xf32>
    %58 = math.tanh %57 : vector<8x32xf32>
    %59 = arith.mulf %54, %58 : vector<8x32xf32>
    %60 = vector.extract_strided_slice %0 {offsets = [0, 2], sizes = [8, 1], strides = [1, 1]} : vector<8x8xf32> to vector<8x1xf32>
    %61 = vector.broadcast %60 : vector<8x1xf32> to vector<8x128xf32>
    %62 = vector.broadcast %1 : vector<1x128xf32> to vector<8x128xf32>
    %63 = arith.mulf %61, %62 : vector<8x128xf32>
    %64 = vector.broadcast %3 : vector<1x128xf32> to vector<8x128xf32>
    %65 = arith.addf %63, %64 : vector<8x128xf32>
    %66 = arith.truncf %59 : vector<8x32xf32> to vector<8x32xbf16>
    %cst_16 = arith.constant dense<0.000000e+00> : vector<8x128xf32>
    %67 = tpu.matmul %66, %2, %cst_16 {dimension_numbers = #tpu.dot_dimension_numbers<[1], [0], [0], [1], [0, 0, 1, 1], [], []>} : vector<8x32xbf16>, vector<32x128xbf16>, vector<8x128xf32> -> vector<8x128xf32>
    %68 = arith.addf %65, %67 : vector<8x128xf32>
    %69 = arith.negf %68 : vector<8x128xf32>
    %70 = math.exp %69 : vector<8x128xf32>
    %cst_17 = arith.constant 1.000000e+00 : f32
    %71 = vector.broadcast %cst_17 : f32 to vector<8x128xf32>
    %72 = arith.addf %71, %70 : vector<8x128xf32>
    %73 = arith.divf %71, %72 : vector<8x128xf32>
    %74 = vector.extract_strided_slice %73 {offsets = [0, 0], sizes = [8, 32], strides = [1, 1]} : vector<8x128xf32> to vector<8x32xf32>
    %75 = vector.extract_strided_slice %73 {offsets = [0, 32], sizes = [8, 32], strides = [1, 1]} : vector<8x128xf32> to vector<8x32xf32>
    %76 = vector.extract_strided_slice %73 {offsets = [0, 64], sizes = [8, 32], strides = [1, 1]} : vector<8x128xf32> to vector<8x32xf32>
    %cst_18 = arith.constant 2.000000e+00 : f32
    %77 = vector.broadcast %cst_18 : f32 to vector<8x32xf32>
    %78 = arith.mulf %77, %76 : vector<8x32xf32>
    %cst_19 = arith.constant 1.000000e+00 : f32
    %79 = vector.broadcast %cst_19 : f32 to vector<8x32xf32>
    %80 = arith.subf %78, %79 : vector<8x32xf32>
    %81 = vector.extract_strided_slice %73 {offsets = [0, 96], sizes = [8, 32], strides = [1, 1]} : vector<8x128xf32> to vector<8x32xf32>
    %82 = arith.mulf %75, %57 : vector<8x32xf32>
    %83 = arith.mulf %74, %80 : vector<8x32xf32>
    %84 = arith.addf %82, %83 : vector<8x32xf32>
    %85 = math.tanh %84 : vector<8x32xf32>
    %86 = arith.mulf %81, %85 : vector<8x32xf32>
    %87 = vector.extract_strided_slice %0 {offsets = [0, 3], sizes = [8, 1], strides = [1, 1]} : vector<8x8xf32> to vector<8x1xf32>
    %88 = vector.broadcast %87 : vector<8x1xf32> to vector<8x128xf32>
    %89 = vector.broadcast %1 : vector<1x128xf32> to vector<8x128xf32>
    %90 = arith.mulf %88, %89 : vector<8x128xf32>
    %91 = vector.broadcast %3 : vector<1x128xf32> to vector<8x128xf32>
    %92 = arith.addf %90, %91 : vector<8x128xf32>
    %93 = arith.truncf %86 : vector<8x32xf32> to vector<8x32xbf16>
    %cst_20 = arith.constant dense<0.000000e+00> : vector<8x128xf32>
    %94 = tpu.matmul %93, %2, %cst_20 {dimension_numbers = #tpu.dot_dimension_numbers<[1], [0], [0], [1], [0, 0, 1, 1], [], []>} : vector<8x32xbf16>, vector<32x128xbf16>, vector<8x128xf32> -> vector<8x128xf32>
    %95 = arith.addf %92, %94 : vector<8x128xf32>
    %96 = arith.negf %95 : vector<8x128xf32>
    %97 = math.exp %96 : vector<8x128xf32>
    %cst_21 = arith.constant 1.000000e+00 : f32
    %98 = vector.broadcast %cst_21 : f32 to vector<8x128xf32>
    %99 = arith.addf %98, %97 : vector<8x128xf32>
    %100 = arith.divf %98, %99 : vector<8x128xf32>
    %101 = vector.extract_strided_slice %100 {offsets = [0, 0], sizes = [8, 32], strides = [1, 1]} : vector<8x128xf32> to vector<8x32xf32>
    %102 = vector.extract_strided_slice %100 {offsets = [0, 32], sizes = [8, 32], strides = [1, 1]} : vector<8x128xf32> to vector<8x32xf32>
    %103 = vector.extract_strided_slice %100 {offsets = [0, 64], sizes = [8, 32], strides = [1, 1]} : vector<8x128xf32> to vector<8x32xf32>
    %cst_22 = arith.constant 2.000000e+00 : f32
    %104 = vector.broadcast %cst_22 : f32 to vector<8x32xf32>
    %105 = arith.mulf %104, %103 : vector<8x32xf32>
    %cst_23 = arith.constant 1.000000e+00 : f32
    %106 = vector.broadcast %cst_23 : f32 to vector<8x32xf32>
    %107 = arith.subf %105, %106 : vector<8x32xf32>
    %108 = vector.extract_strided_slice %100 {offsets = [0, 96], sizes = [8, 32], strides = [1, 1]} : vector<8x128xf32> to vector<8x32xf32>
    %109 = arith.mulf %102, %84 : vector<8x32xf32>
    %110 = arith.mulf %101, %107 : vector<8x32xf32>
    %111 = arith.addf %109, %110 : vector<8x32xf32>
    %112 = math.tanh %111 : vector<8x32xf32>
    %113 = arith.mulf %108, %112 : vector<8x32xf32>
    %114 = vector.extract_strided_slice %0 {offsets = [0, 4], sizes = [8, 1], strides = [1, 1]} : vector<8x8xf32> to vector<8x1xf32>
    %115 = vector.broadcast %114 : vector<8x1xf32> to vector<8x128xf32>
    %116 = vector.broadcast %1 : vector<1x128xf32> to vector<8x128xf32>
    %117 = arith.mulf %115, %116 : vector<8x128xf32>
    %118 = vector.broadcast %3 : vector<1x128xf32> to vector<8x128xf32>
    %119 = arith.addf %117, %118 : vector<8x128xf32>
    %120 = arith.truncf %113 : vector<8x32xf32> to vector<8x32xbf16>
    %cst_24 = arith.constant dense<0.000000e+00> : vector<8x128xf32>
    %121 = tpu.matmul %120, %2, %cst_24 {dimension_numbers = #tpu.dot_dimension_numbers<[1], [0], [0], [1], [0, 0, 1, 1], [], []>} : vector<8x32xbf16>, vector<32x128xbf16>, vector<8x128xf32> -> vector<8x128xf32>
    %122 = arith.addf %119, %121 : vector<8x128xf32>
    %123 = arith.negf %122 : vector<8x128xf32>
    %124 = math.exp %123 : vector<8x128xf32>
    %cst_25 = arith.constant 1.000000e+00 : f32
    %125 = vector.broadcast %cst_25 : f32 to vector<8x128xf32>
    %126 = arith.addf %125, %124 : vector<8x128xf32>
    %127 = arith.divf %125, %126 : vector<8x128xf32>
    %128 = vector.extract_strided_slice %127 {offsets = [0, 0], sizes = [8, 32], strides = [1, 1]} : vector<8x128xf32> to vector<8x32xf32>
    %129 = vector.extract_strided_slice %127 {offsets = [0, 32], sizes = [8, 32], strides = [1, 1]} : vector<8x128xf32> to vector<8x32xf32>
    %130 = vector.extract_strided_slice %127 {offsets = [0, 64], sizes = [8, 32], strides = [1, 1]} : vector<8x128xf32> to vector<8x32xf32>
    %cst_26 = arith.constant 2.000000e+00 : f32
    %131 = vector.broadcast %cst_26 : f32 to vector<8x32xf32>
    %132 = arith.mulf %131, %130 : vector<8x32xf32>
    %cst_27 = arith.constant 1.000000e+00 : f32
    %133 = vector.broadcast %cst_27 : f32 to vector<8x32xf32>
    %134 = arith.subf %132, %133 : vector<8x32xf32>
    %135 = vector.extract_strided_slice %127 {offsets = [0, 96], sizes = [8, 32], strides = [1, 1]} : vector<8x128xf32> to vector<8x32xf32>
    %136 = arith.mulf %129, %111 : vector<8x32xf32>
    %137 = arith.mulf %128, %134 : vector<8x32xf32>
    %138 = arith.addf %136, %137 : vector<8x32xf32>
    %139 = math.tanh %138 : vector<8x32xf32>
    %140 = arith.mulf %135, %139 : vector<8x32xf32>
    %141 = vector.extract_strided_slice %0 {offsets = [0, 5], sizes = [8, 1], strides = [1, 1]} : vector<8x8xf32> to vector<8x1xf32>
    %142 = vector.broadcast %141 : vector<8x1xf32> to vector<8x128xf32>
    %143 = vector.broadcast %1 : vector<1x128xf32> to vector<8x128xf32>
    %144 = arith.mulf %142, %143 : vector<8x128xf32>
    %145 = vector.broadcast %3 : vector<1x128xf32> to vector<8x128xf32>
    %146 = arith.addf %144, %145 : vector<8x128xf32>
    %147 = arith.truncf %140 : vector<8x32xf32> to vector<8x32xbf16>
    %cst_28 = arith.constant dense<0.000000e+00> : vector<8x128xf32>
    %148 = tpu.matmul %147, %2, %cst_28 {dimension_numbers = #tpu.dot_dimension_numbers<[1], [0], [0], [1], [0, 0, 1, 1], [], []>} : vector<8x32xbf16>, vector<32x128xbf16>, vector<8x128xf32> -> vector<8x128xf32>
    %149 = arith.addf %146, %148 : vector<8x128xf32>
    %150 = arith.negf %149 : vector<8x128xf32>
    %151 = math.exp %150 : vector<8x128xf32>
    %cst_29 = arith.constant 1.000000e+00 : f32
    %152 = vector.broadcast %cst_29 : f32 to vector<8x128xf32>
    %153 = arith.addf %152, %151 : vector<8x128xf32>
    %154 = arith.divf %152, %153 : vector<8x128xf32>
    %155 = vector.extract_strided_slice %154 {offsets = [0, 0], sizes = [8, 32], strides = [1, 1]} : vector<8x128xf32> to vector<8x32xf32>
    %156 = vector.extract_strided_slice %154 {offsets = [0, 32], sizes = [8, 32], strides = [1, 1]} : vector<8x128xf32> to vector<8x32xf32>
    %157 = vector.extract_strided_slice %154 {offsets = [0, 64], sizes = [8, 32], strides = [1, 1]} : vector<8x128xf32> to vector<8x32xf32>
    %cst_30 = arith.constant 2.000000e+00 : f32
    %158 = vector.broadcast %cst_30 : f32 to vector<8x32xf32>
    %159 = arith.mulf %158, %157 : vector<8x32xf32>
    %cst_31 = arith.constant 1.000000e+00 : f32
    %160 = vector.broadcast %cst_31 : f32 to vector<8x32xf32>
    %161 = arith.subf %159, %160 : vector<8x32xf32>
    %162 = vector.extract_strided_slice %154 {offsets = [0, 96], sizes = [8, 32], strides = [1, 1]} : vector<8x128xf32> to vector<8x32xf32>
    %163 = arith.mulf %156, %138 : vector<8x32xf32>
    %164 = arith.mulf %155, %161 : vector<8x32xf32>
    %165 = arith.addf %163, %164 : vector<8x32xf32>
    %166 = math.tanh %165 : vector<8x32xf32>
    %167 = arith.mulf %162, %166 : vector<8x32xf32>
    %168 = vector.extract_strided_slice %0 {offsets = [0, 6], sizes = [8, 1], strides = [1, 1]} : vector<8x8xf32> to vector<8x1xf32>
    %169 = vector.broadcast %168 : vector<8x1xf32> to vector<8x128xf32>
    %170 = vector.broadcast %1 : vector<1x128xf32> to vector<8x128xf32>
    %171 = arith.mulf %169, %170 : vector<8x128xf32>
    %172 = vector.broadcast %3 : vector<1x128xf32> to vector<8x128xf32>
    %173 = arith.addf %171, %172 : vector<8x128xf32>
    %174 = arith.truncf %167 : vector<8x32xf32> to vector<8x32xbf16>
    %cst_32 = arith.constant dense<0.000000e+00> : vector<8x128xf32>
    %175 = tpu.matmul %174, %2, %cst_32 {dimension_numbers = #tpu.dot_dimension_numbers<[1], [0], [0], [1], [0, 0, 1, 1], [], []>} : vector<8x32xbf16>, vector<32x128xbf16>, vector<8x128xf32> -> vector<8x128xf32>
    %176 = arith.addf %173, %175 : vector<8x128xf32>
    %177 = arith.negf %176 : vector<8x128xf32>
    %178 = math.exp %177 : vector<8x128xf32>
    %cst_33 = arith.constant 1.000000e+00 : f32
    %179 = vector.broadcast %cst_33 : f32 to vector<8x128xf32>
    %180 = arith.addf %179, %178 : vector<8x128xf32>
    %181 = arith.divf %179, %180 : vector<8x128xf32>
    %182 = vector.extract_strided_slice %181 {offsets = [0, 0], sizes = [8, 32], strides = [1, 1]} : vector<8x128xf32> to vector<8x32xf32>
    %183 = vector.extract_strided_slice %181 {offsets = [0, 32], sizes = [8, 32], strides = [1, 1]} : vector<8x128xf32> to vector<8x32xf32>
    %184 = vector.extract_strided_slice %181 {offsets = [0, 64], sizes = [8, 32], strides = [1, 1]} : vector<8x128xf32> to vector<8x32xf32>
    %cst_34 = arith.constant 2.000000e+00 : f32
    %185 = vector.broadcast %cst_34 : f32 to vector<8x32xf32>
    %186 = arith.mulf %185, %184 : vector<8x32xf32>
    %cst_35 = arith.constant 1.000000e+00 : f32
    %187 = vector.broadcast %cst_35 : f32 to vector<8x32xf32>
    %188 = arith.subf %186, %187 : vector<8x32xf32>
    %189 = vector.extract_strided_slice %181 {offsets = [0, 96], sizes = [8, 32], strides = [1, 1]} : vector<8x128xf32> to vector<8x32xf32>
    %190 = arith.mulf %183, %165 : vector<8x32xf32>
    %191 = arith.mulf %182, %188 : vector<8x32xf32>
    %192 = arith.addf %190, %191 : vector<8x32xf32>
    %193 = math.tanh %192 : vector<8x32xf32>
    %194 = arith.mulf %189, %193 : vector<8x32xf32>
    %195 = vector.extract_strided_slice %0 {offsets = [0, 7], sizes = [8, 1], strides = [1, 1]} : vector<8x8xf32> to vector<8x1xf32>
    %196 = vector.broadcast %195 : vector<8x1xf32> to vector<8x128xf32>
    %197 = vector.broadcast %1 : vector<1x128xf32> to vector<8x128xf32>
    %198 = arith.mulf %196, %197 : vector<8x128xf32>
    %199 = vector.broadcast %3 : vector<1x128xf32> to vector<8x128xf32>
    %200 = arith.addf %198, %199 : vector<8x128xf32>
    %201 = arith.truncf %194 : vector<8x32xf32> to vector<8x32xbf16>
    %cst_36 = arith.constant dense<0.000000e+00> : vector<8x128xf32>
    %202 = tpu.matmul %201, %2, %cst_36 {dimension_numbers = #tpu.dot_dimension_numbers<[1], [0], [0], [1], [0, 0, 1, 1], [], []>} : vector<8x32xbf16>, vector<32x128xbf16>, vector<8x128xf32> -> vector<8x128xf32>
    %203 = arith.addf %200, %202 : vector<8x128xf32>
    %204 = arith.negf %203 : vector<8x128xf32>
    %205 = math.exp %204 : vector<8x128xf32>
    %cst_37 = arith.constant 1.000000e+00 : f32
    %206 = vector.broadcast %cst_37 : f32 to vector<8x128xf32>
    %207 = arith.addf %206, %205 : vector<8x128xf32>
    %208 = arith.divf %206, %207 : vector<8x128xf32>
    %209 = vector.extract_strided_slice %208 {offsets = [0, 0], sizes = [8, 32], strides = [1, 1]} : vector<8x128xf32> to vector<8x32xf32>
    %210 = vector.extract_strided_slice %208 {offsets = [0, 32], sizes = [8, 32], strides = [1, 1]} : vector<8x128xf32> to vector<8x32xf32>
    %211 = vector.extract_strided_slice %208 {offsets = [0, 64], sizes = [8, 32], strides = [1, 1]} : vector<8x128xf32> to vector<8x32xf32>
    %cst_38 = arith.constant 2.000000e+00 : f32
    %212 = vector.broadcast %cst_38 : f32 to vector<8x32xf32>
    %213 = arith.mulf %212, %211 : vector<8x32xf32>
    %cst_39 = arith.constant 1.000000e+00 : f32
    %214 = vector.broadcast %cst_39 : f32 to vector<8x32xf32>
    %215 = arith.subf %213, %214 : vector<8x32xf32>
    %216 = vector.extract_strided_slice %208 {offsets = [0, 96], sizes = [8, 32], strides = [1, 1]} : vector<8x128xf32> to vector<8x32xf32>
    %217 = arith.mulf %210, %192 : vector<8x32xf32>
    %218 = arith.mulf %209, %215 : vector<8x32xf32>
    %219 = arith.addf %217, %218 : vector<8x32xf32>
    %220 = math.tanh %219 : vector<8x32xf32>
    %221 = arith.mulf %216, %220 : vector<8x32xf32>
    %cst_40 = arith.constant 0.000000e+00 : f32
    %222 = vector.broadcast %cst_40 : f32 to vector<8x32xf32>
    %223 = arith.cmpf ogt, %221, %222 : vector<8x32xf32>
    %cst_41 = arith.constant 0.00999999977 : f32
    %224 = vector.broadcast %cst_41 : f32 to vector<8x32xf32>
    %225 = arith.mulf %224, %221 : vector<8x32xf32>
    %226 = arith.select %223, %221, %225 : vector<8x32xi1>, vector<8x32xf32>
    %227 = arith.truncf %226 : vector<8x32xf32> to vector<8x32xbf16>
    %c0_42 = arith.constant 0 : index
    %c0_43 = arith.constant 0 : index
    %228 = vector.load %arg5[%c0_42, %c0_43] : memref<32x128xbf16, #tpu.memory_space<vmem>>, vector<32x128xbf16>
    %cst_44 = arith.constant dense<0.000000e+00> : vector<8x128xf32>
    %229 = tpu.matmul %227, %228, %cst_44 {dimension_numbers = #tpu.dot_dimension_numbers<[1], [0], [0], [1], [0, 0, 1, 1], [], []>} : vector<8x32xbf16>, vector<32x128xbf16>, vector<8x128xf32> -> vector<8x128xf32>
    %c0_45 = arith.constant 0 : index
    %c0_46 = arith.constant 0 : index
    %230 = vector.load %arg6[%c0_45, %c0_46] : memref<1x128xf32, #tpu.memory_space<vmem>>, vector<1x128xf32>
    %231 = vector.broadcast %230 : vector<1x128xf32> to vector<8x128xf32>
    %232 = arith.addf %229, %231 : vector<8x128xf32>
    %c0_47 = arith.constant 0 : index
    %c0_48 = arith.constant 0 : index
    %233 = vector.load %arg7[%c0_47, %c0_48] : memref<8x128xf32, #tpu.memory_space<vmem>>, vector<8x128xf32>
    tpu.vector_store %arg7[%c0_47, %c0_48], %232 {strides = array<i32>} : memref<8x128xf32, #tpu.memory_space<vmem>>, vector<8x128xf32>,
    return
  }
  func.func @transform_0(%arg0: i32) -> (i32, i32) {
    %c0_i32 = arith.constant 0 : i32
    %c0_i32_0 = arith.constant 0 : i32
    return %arg0, %c0_i32 : i32, i32
  }
  func.func @transform_1(%arg0: i32) -> (i32, i32) {
    %c0_i32 = arith.constant 0 : i32
    %c0_i32_0 = arith.constant 0 : i32
    %c0_i32_1 = arith.constant 0 : i32
    return %c0_i32, %c0_i32_0 : i32, i32
  }
  func.func @transform_2(%arg0: i32) -> (i32, i32) {
    %c0_i32 = arith.constant 0 : i32
    %c0_i32_0 = arith.constant 0 : i32
    %c0_i32_1 = arith.constant 0 : i32
    return %c0_i32, %c0_i32_0 : i32, i32
  }
  func.func @transform_3(%arg0: i32) -> (i32, i32) {
    %c0_i32 = arith.constant 0 : i32
    %c0_i32_0 = arith.constant 0 : i32
    %c0_i32_1 = arith.constant 0 : i32
    return %c0_i32, %c0_i32_0 : i32, i32
  }
  func.func @transform_4(%arg0: i32) -> (i32, i32) {
    %c0_i32 = arith.constant 0 : i32
    %c0_i32_0 = arith.constant 0 : i32
    %c0_i32_1 = arith.constant 0 : i32
    return %c0_i32, %c0_i32_0 : i32, i32
  }
  func.func @transform_5(%arg0: i32) -> (i32, i32) {
    %c0_i32 = arith.constant 0 : i32
    %c0_i32_0 = arith.constant 0 : i32
    %c0_i32_1 = arith.constant 0 : i32
    return %c0_i32, %c0_i32_0 : i32, i32
  }
  func.func @transform_6(%arg0: i32) -> (i32, i32) {
    %c0_i32 = arith.constant 0 : i32
    %c0_i32_0 = arith.constant 0 : i32
    return %arg0, %c0_i32 : i32, i32
  }
}

</mosaic_0001>

<bundles_post_ra>
// kernel: tpu_custom_call.1
= control target key start
LH: loop header
LB: loop body
LE: loop exit
PB: predicated region body
PF: predicated region fallthrough
CT: control target
= control target key end

     0   :  { %11 = vsyncpa [#allocation3], 0  ;;  %s1357_s0 = inlined_call_operand.hbm [shape: f32[8,8], index: 0, kind: input, shape index: {}]   ;;  %s1358_s1 = inlined_call_operand.vmem [shape: f32[1,128], index: 1, kind: input, shape index: {}]   ;;  %s1359_s2 = inlined_call_operand.hbm [shape: bf16[32,128], index: 2, kind: input, shape index: {}]   ;;  %s1360_s3 = inlined_call_operand.vmem [shape: f32[1,128], index: 3, kind: input, shape index: {}]   ;;  %s1361_s4 = inlined_call_operand.hbm [shape: bf16[32,128], index: 4, kind: input, shape index: {}]   ;;  %s1362_s5 = inlined_call_operand.vmem [shape: f32[1,128], index: 5, kind: input, shape index: {}]   ;;  %s1363_s6 = inlined_call_operand.hbm [shape: f32[8,128], index: 6, kind: output, shape index: {}]  }
   0x1   :  { %12 = vsyncpa [#allocation6], 0 }
   0x2   :  { %13 = vsyncpa [#allocation4], 0  ;;  %s1116_s21 = smov [#allocation5]   ;;  %s1022_s25 = scalar_lea.hbm %s1359_s2, 256 }
   0x3   :  { %s31_s22 = sshll.u32 %s1116_s21, 4  ;;  %p1023_p0 = scmp.ne.s32.totalorder %s1359_s2, %s1022_s25  ;;  %s32_s22 = int_to_ptr.vmem [resolvable:$true] %s31_s22 }
   0x4   :  { %p1026_p1 = scmp.lt.u32.totalorder %s1022_s25, %s1359_s2 }
   0x6   :  { %p1028_p2 = pnand %p1026_p1, %p1023_p0 }
   0x8   :  { %1031 = shalt.err (!%p1028_p2)
}
   0x9   :  { %s1032_s30 = scalar_lea.vmem %s32_s22, 256  ;;  %p1037_p4 = scmp.lt.s32.totalorder %s32_s22, %s32_s22 }
   0xa   :  { %p1033_p3 = scmp.ne.s32.totalorder %s32_s22, %s1032_s30  ;;  %p1038_p5 = scmp.lt.s32.totalorder %s1032_s30, %s1032_s30 }
   0xc   :  { %p1039_p6 = por %p1038_p5, %p1037_p4 }
   0xe   :  { %p1040_p7 = pnand %p1039_p6, %p1033_p3 }
  0x10   :  { %1043 = shalt.err (!%p1040_p7)
}
  0x11   :  { %s1117_s7 = smov 64   ;;  %s1118_s8 = smov 4  }
  0x12   :  { %37 = dma.hbm_to_vmem [thread:$0]  %s1359_s2, 256, %s32_s22, [#allocation6], %s1117_s7, %s1117_s7, %s1118_s8  }
  0x13   :  { %s1119_s11 = smov [#allocation2]   ;;  %s1120_s13 = smov [#allocation7]  }
  0x14   :  { %s20_s12 = sshll.u32 %s1119_s11, 4  ;;  %s45_s14 = sshll.u32 %s1120_s13, 4  ;;  %s21_s12 = int_to_ptr.vmem [resolvable:$true] %s20_s12  ;;  %s46_s14 = int_to_ptr.vmem [resolvable:$true] %s45_s14 }
  0x15   :  { %s1044_s17 = scalar_lea.hbm %s1357_s0, 128 }
  0x16   :  { %p1045_p8 = scmp.ne.s32.totalorder %s1357_s0, %s1044_s17  ;;  %p1048_p9 = scmp.lt.u32.totalorder %s1044_s17, %s1357_s0 }
  0x18   :  { %p1050_p10 = pnand %p1048_p9, %p1045_p8 }
  0x1a   :  { %1053 = shalt.err (!%p1050_p10)
}
  0x1b   :  { %s1054_s2 = scalar_lea.vmem %s21_s12, 128  ;;  %p1059_p12 = scmp.lt.s32.totalorder %s21_s12, %s21_s12 }
  0x1c   :  { %p1055_p11 = scmp.ne.s32.totalorder %s21_s12, %s1054_s2  ;;  %p1060_p13 = scmp.lt.s32.totalorder %s1054_s2, %s1054_s2 }
  0x1e   :  { %p1061_p0 = por %p1060_p13, %p1059_p12 }
  0x20   :  { %p1062_p1 = pnand %p1061_p0, %p1055_p11 }
  0x22   :  { %1065 = shalt.err (!%p1062_p1)
}
  0x23   :  { %23 = dma.hbm_to_vmem [thread:$0]  %s1357_s0, 128, %s21_s12, [#allocation3]  }
  0x24   :  { %s1066_s26 = scalar_lea.hbm %s1361_s4, 256 }
  0x25   :  { %p1067_p2 = scmp.ne.s32.totalorder %s1361_s4, %s1066_s26  ;;  %p1070_p3 = scmp.lt.u32.totalorder %s1066_s26, %s1361_s4 }
  0x27   :  { %p1072_p4 = pnand %p1070_p3, %p1067_p2 }
  0x29   :  { %1075 = shalt.err (!%p1072_p4)
}
  0x2a   :  { %s1076_s9 = scalar_lea.vmem %s46_s14, 256  ;;  %p1081_p6 = scmp.lt.s32.totalorder %s46_s14, %s46_s14 }
  0x2b   :  { %p1077_p5 = scmp.ne.s32.totalorder %s46_s14, %s1076_s9  ;;  %p1082_p7 = scmp.lt.s32.totalorder %s1076_s9, %s1076_s9 }
  0x2d   :  { %p1083_p8 = por %p1082_p7, %p1081_p6 }
  0x2f   :  { %p1084_p9 = pnand %p1083_p8, %p1077_p5 }
  0x31   :  { %1087 = shalt.err (!%p1084_p9)
}
  0x32   :  { %51 = dma.hbm_to_vmem [thread:$0]  %s1361_s4, 256, %s46_s14, [#allocation6], %s1117_s7, %s1117_s7, %s1118_s8  }
  0x33   :  { %1110 = dma.done.wait [#allocation3], 128  }
  0x34   :  { %1111 = vsyncadd [#allocation3], 4294967168 }
  0x35   :  { %1112 = dma.done.wait [#allocation6], 512  }
  0x36   :  { %1113 = vsyncadd [#allocation6], 4294966784  ;;  %v1121_v0 = vmov 0.0   ;;  %vm1122_vm0 = vmmov 0   ;;  %v1123_v1 = vmov 0   ;;  %v1216_v2 = vld [vmem:[#allocation5] sm:$0xff]  }
  0x37   :  { %873 = vmatprep.subr.bf16.mxu0 %v1121_v0  ;;  %877 = vmatprep.mubr.msk.bf16.mxu0 %vm1122_vm0, %v1121_v0  ;;  %v1219_v3 = vld [vmem:[#allocation5 + $0x8] sm:$0xff]   ;;  %v1221_v4 = vld [vmem:[#allocation2] sm:$0xff]  ;;  %v1125_v27 = vmov 1   ;;  %vm102_vm1 = vcmask 261120   ;;  %v1126_v52 = vmov 2   ;;  %s1132_s14 = smov [#allocation8]  }
  0x38   :  { %962 = vset.pattern.permute.xlu0 %v1123_v1  ;;  %881 = vmatprep.subr.bf16.mxu1 %v1121_v0  ;;  %v1240_v5 = vld [vmem:[%s1358_s1] ss:$0 sm:$0xff]  ;;  %s1124_s1 = smov 32   ;;  %s805_s15 = sshll.u32 %s1132_s14, 4  ;;  %s806_s15 = int_to_ptr.vmem [resolvable:$true] %s805_s15 }
  0x39   :  { %885 = vmatprep.mubr.msk.bf16.mxu1 %vm1122_vm0, %v1121_v0  ;;  %874 = vmatpush3.bf16.msra.mxu0 %v1216_v2  ;;  %v1246_v8 = vld [vmem:[%s1360_s3] ss:$0 sm:$0xff]  ;;  %p1093_p11 = scmp.lt.s32.totalorder %s806_s15, %s806_s15 }
  0x3a   :  { %882 = vmatpush3.bf16.msra.mxu1 %v1216_v2  ;;  %875 = vmatprep.subr.bf16.mxu0 %v1121_v0 }
  0x3b   :  { %73 = vperm.xlu0 %962, %v1221_v4   ;;  %883 = vmatprep.subr.bf16.mxu1 %v1121_v0 }
  0x3c   :  { %963 = vset.pattern.permute.xlu1 %v1125_v27 }
  0x3d   :  { %876 = vmatpush3.bf16.msra.mxu0 %v1219_v3 }
  0x3e   :  { %884 = vmatpush3.bf16.msra.mxu1 %v1219_v3  ;;  %889 = vmatprep.subr.bf16.mxu0 %v1121_v0 }
  0x3f   :  { %897 = vmatprep.subr.bf16.mxu1 %v1121_v0  ;;  %964 = vset.pattern.permute.xlu0 %v1126_v52 }
  0x40   :  { %878 = vmatmul.mubr.bf16.vlgmr.msra.gmra.mrb[0].mxu0 %v1123_v1 }
  0x41   :  { %890 = vmatpush3.bf16.msra.mxu0 %v1216_v2  ;;  %893 = vmatprep.mubr.msk.bf16.mxu0 %vm1122_vm0, %v1121_v0 }
  0x42   :  { %891 = vmatprep.subr.bf16.mxu0 %v1121_v0 }
  0x45   :  { %892 = vmatpush3.bf16.msra.mxu0 %v1219_v3 }
  0x46   :  { %905 = vmatprep.subr.bf16.mxu0 %v1121_v0 }
  0xba   :  { %v74_v6 = vpop.permute.xlu0 %73 }
  0xbb   :  { %v82_v7 = vmul.f32 %v1240_v5, %v74_v6 }
  0xbd   :  { %v89_v9 = vadd.f32 %v1246_v8, %v82_v7 }
 0x113   :  { %v140_v10 = vpop.f32.mrb[0].mxu0 }
 0x114   :  { %v146_v11 = vadd.f32 %v140_v10, %v89_v9  ;;  %v879_v12 = vpop.f32.mrb[1].mxu0 }
 0x115   :  { %v143_v13 = vpop.f32.mrb[2].mxu0 }
 0x116   :  { %v819_v14 = vmul.f32 -1.442695, %v146_v11  ;;  %v880_v15 = vpop.f32.mrb[3].mxu0 }
 0x118   :  { %974 = vpow2.f32 %v819_v14 }
 0x122   :  { %v975_v16 = vpop.eup %974 }
 0x123   :  { %v150_v17 = vadd.f32 1.0, %v975_v16 }
 0x125   :  { %976 = vrcp.f32 %v150_v17 }
 0x12f   :  { %v977_v18 = vpop.eup %976 }
 0x130   :  { %v153_v19 = vmul.f32 2.0, %v977_v18  ;;  %v155_v23 = vmul.f32 0.0, %v977_v18 }
 0x132   :  { %v820_v20 = vadd.f32 -1.0, %v153_v19  ;;  %v1127_v19 = vmov 3  }
 0x134   :  { %157 = vrot.lane.b32.xlu0 %v820_v20, %s1117_s7 }
 0x1a6   :  { %v158_v21 = vpop.permute.xlu0 %157 }
 0x1a7   :  { %v160_v22 = vmul.f32 %v977_v18, %v158_v21 }
 0x1a9   :  { %162 = vrot.lane.b32.xlu1 %v160_v22, %s1124_s1 }
 0x21b   :  { %v163_v24 = vpop.permute.xlu1 %162 }
 0x21c   :  { %v165_v25 = vadd.f32 %v163_v24, %v155_v23 }
 0x21e   :  { %978 = vtanh.f32 %v165_v25 }
 0x228   :  { %v979_v26 = vpop.eup %978 }
 0x229   :  { %168 = vrot.lane.b32.xlu1 %v979_v26, %s1117_s7 }
 0x22d   :  { %173 = vperm.xlu1 %963, %v1221_v4  }
 0x29b   :  { %v169_v28 = vpop.permute.xlu1 %168 }
 0x29c   :  { %v171_v29 = vmul.f32 %v977_v18, %v169_v28 }
 0x29e   :  { %v178_v30 = vpack.c.bf16 %v171_v29, %v171_v29 }
 0x2a0   :  { %180 = vrot.lane.b32.xlu0 %v178_v30, %s1124_s1 }
 0x2ac   :  { %v174_v32 = vpop.permute.xlu1 %173 }
 0x2ad   :  { %v176_v33 = vmul.f32 %v1240_v5, %v174_v32 }
 0x2af   :  { %v177_v34 = vadd.f32 %v1246_v8, %v176_v33 }
 0x312   :  { %v181_v31 = vpop.permute.xlu0 %180 }
 0x313   :  { %886 = vmatmul.mubr.msk.bf16.vlgmr.msra.gmra.mrb[0].mxu1 %vm102_vm1, %v181_v31 }
 0x314   :  { %898 = vmatpush3.bf16.msra.mxu1 %v1216_v2  ;;  %901 = vmatprep.mubr.msk.bf16.mxu1 %vm1122_vm0, %v1121_v0 }
 0x315   :  { %899 = vmatprep.subr.bf16.mxu1 %v1121_v0 }
 0x318   :  { %900 = vmatpush3.bf16.msra.mxu1 %v1219_v3 }
 0x319   :  { %913 = vmatprep.subr.bf16.mxu1 %v1121_v0 }
 0x3e6   :  { %v219_v35 = vpop.f32.mrb[0].mxu1 }
 0x3e7   :  { %v225_v36 = vadd.f32 %v219_v35, %v177_v34  ;;  %v887_v37 = vpop.f32.mrb[1].mxu1 }
 0x3e8   :  { %v222_v38 = vpop.f32.mrb[2].mxu1 }
 0x3e9   :  { %v822_v39 = vmul.f32 -1.442695, %v225_v36  ;;  %v888_v40 = vpop.f32.mrb[3].mxu1 }
 0x3eb   :  { %980 = vpow2.f32 %v822_v39 }
 0x3f5   :  { %v981_v41 = vpop.eup %980 }
 0x3f6   :  { %v229_v42 = vadd.f32 1.0, %v981_v41 }
 0x3f8   :  { %982 = vrcp.f32 %v229_v42 }
 0x402   :  { %v983_v43 = vpop.eup %982 }
 0x403   :  { %v232_v44 = vmul.f32 2.0, %v983_v43  ;;  %v234_v48 = vmul.f32 %v983_v43, %v165_v25 }
 0x405   :  { %v823_v45 = vadd.f32 -1.0, %v232_v44  ;;  %v1128_v44 = vmov 4  }
 0x407   :  { %236 = vrot.lane.b32.xlu0 %v823_v45, %s1117_s7 }
 0x479   :  { %v237_v46 = vpop.permute.xlu0 %236 }
 0x47a   :  { %v239_v47 = vmul.f32 %v983_v43, %v237_v46 }
 0x47c   :  { %241 = vrot.lane.b32.xlu1 %v239_v47, %s1124_s1 }
 0x4ee   :  { %v242_v49 = vpop.permute.xlu1 %241 }
 0x4ef   :  { %v244_v50 = vadd.f32 %v242_v49, %v234_v48 }
 0x4f1   :  { %984 = vtanh.f32 %v244_v50 }
 0x4fb   :  { %v985_v51 = vpop.eup %984 }
 0x4fc   :  { %247 = vrot.lane.b32.xlu0 %v985_v51, %s1117_s7 }
 0x500   :  { %252 = vperm.xlu0 %964, %v1221_v4  }
 0x504   :  { %965 = vset.pattern.permute.xlu0 %v1127_v19 }
 0x56e   :  { %v248_v53 = vpop.permute.xlu0 %247 }
 0x56f   :  { %v250_v54 = vmul.f32 %v983_v43, %v248_v53 }
 0x571   :  { %v257_v55 = vpack.c.bf16 %v250_v54, %v250_v54 }
 0x573   :  { %259 = vrot.lane.b32.xlu1 %v257_v55, %s1124_s1 }
 0x57f   :  { %v253_v57 = vpop.permute.xlu0 %252 }
 0x580   :  { %v255_v58 = vmul.f32 %v1240_v5, %v253_v57 }
 0x582   :  { %v256_v59 = vadd.f32 %v1246_v8, %v255_v58 }
 0x5e5   :  { %v260_v56 = vpop.permute.xlu1 %259 }
 0x5e6   :  { %894 = vmatmul.mubr.msk.bf16.vlgmr.msra.gmra.mrb[4].mxu0 %vm102_vm1, %v260_v56 }
 0x5e7   :  { %906 = vmatpush3.bf16.msra.mxu0 %v1216_v2  ;;  %909 = vmatprep.mubr.msk.bf16.mxu0 %vm1122_vm0, %v1121_v0 }
 0x5e8   :  { %907 = vmatprep.subr.bf16.mxu0 %v1121_v0 }
 0x5eb   :  { %908 = vmatpush3.bf16.msra.mxu0 %v1219_v3 }
 0x5ec   :  { %921 = vmatprep.subr.bf16.mxu0 %v1121_v0 }
 0x6b9   :  { %v298_v60 = vpop.f32.mrb[4].mxu0 }
 0x6ba   :  { %v304_v61 = vadd.f32 %v298_v60, %v256_v59  ;;  %v895_v62 = vpop.f32.mrb[5].mxu0 }
 0x6bb   :  { %v301_v63 = vpop.f32.mrb[6].mxu0 }
 0x6bc   :  { %v825_v1 = vmul.f32 -1.442695, %v304_v61  ;;  %v896_v6 = vpop.f32.mrb[7].mxu0 }
 0x6be   :  { %986 = vpow2.f32 %v825_v1 }
 0x6c8   :  { %v987_v7 = vpop.eup %986 }
 0x6c9   :  { %v308_v9 = vadd.f32 1.0, %v987_v7 }
 0x6cb   :  { %988 = vrcp.f32 %v308_v9 }
 0x6d5   :  { %v989_v10 = vpop.eup %988 }
 0x6d6   :  { %v311_v11 = vmul.f32 2.0, %v989_v10  ;;  %v313_v15 = vmul.f32 %v989_v10, %v244_v50 }
 0x6d8   :  { %v826_v12 = vadd.f32 -1.0, %v311_v11  ;;  %v1129_v11 = vmov 5  }
 0x6da   :  { %315 = vrot.lane.b32.xlu1 %v826_v12, %s1117_s7 }
 0x74c   :  { %v316_v13 = vpop.permute.xlu1 %315 }
 0x74d   :  { %v318_v14 = vmul.f32 %v989_v10, %v316_v13 }
 0x74f   :  { %320 = vrot.lane.b32.xlu1 %v318_v14, %s1124_s1 }
 0x7c1   :  { %v321_v16 = vpop.permute.xlu1 %320 }
 0x7c2   :  { %v323_v17 = vadd.f32 %v321_v16, %v313_v15 }
 0x7c4   :  { %990 = vtanh.f32 %v323_v17 }
 0x7ce   :  { %v991_v18 = vpop.eup %990 }
 0x7cf   :  { %326 = vrot.lane.b32.xlu0 %v991_v18, %s1117_s7 }
 0x7d3   :  { %331 = vperm.xlu0 %965, %v1221_v4  }
 0x7d7   :  { %966 = vset.pattern.permute.xlu0 %v1128_v44 }
 0x841   :  { %v327_v20 = vpop.permute.xlu0 %326 }
 0x842   :  { %v329_v21 = vmul.f32 %v989_v10, %v327_v20 }
 0x844   :  { %v336_v22 = vpack.c.bf16 %v329_v21, %v329_v21 }
 0x846   :  { %338 = vrot.lane.b32.xlu1 %v336_v22, %s1124_s1 }
 0x852   :  { %v332_v24 = vpop.permute.xlu0 %331 }
 0x853   :  { %v334_v25 = vmul.f32 %v1240_v5, %v332_v24 }
 0x855   :  { %v335_v26 = vadd.f32 %v1246_v8, %v334_v25 }
 0x8b8   :  { %v339_v23 = vpop.permute.xlu1 %338 }
 0x8b9   :  { %902 = vmatmul.mubr.msk.bf16.vlgmr.msra.gmra.mrb[4].mxu1 %vm102_vm1, %v339_v23 }
 0x8ba   :  { %914 = vmatpush3.bf16.msra.mxu1 %v1216_v2  ;;  %917 = vmatprep.mubr.msk.bf16.mxu1 %vm1122_vm0, %v1121_v0 }
 0x8bb   :  { %915 = vmatprep.subr.bf16.mxu1 %v1121_v0 }
 0x8be   :  { %916 = vmatpush3.bf16.msra.mxu1 %v1219_v3 }
 0x8bf   :  { %929 = vmatprep.subr.bf16.mxu1 %v1121_v0 }
 0x98c   :  { %v377_v27 = vpop.f32.mrb[4].mxu1 }
 0x98d   :  { %v383_v28 = vadd.f32 %v377_v27, %v335_v26  ;;  %v903_v29 = vpop.f32.mrb[5].mxu1 }
 0x98e   :  { %v380_v30 = vpop.f32.mrb[6].mxu1 }
 0x98f   :  { %v828_v31 = vmul.f32 -1.442695, %v383_v28  ;;  %v904_v32 = vpop.f32.mrb[7].mxu1 }
 0x991   :  { %992 = vpow2.f32 %v828_v31 }
 0x99b   :  { %v993_v33 = vpop.eup %992 }
 0x99c   :  { %v387_v34 = vadd.f32 1.0, %v993_v33 }
 0x99e   :  { %994 = vrcp.f32 %v387_v34  ;;  %v1130_v34 = vmov 6  }
 0x9a8   :  { %v995_v35 = vpop.eup %994 }
 0x9a9   :  { %v390_v36 = vmul.f32 2.0, %v995_v35  ;;  %v392_v40 = vmul.f32 %v995_v35, %v323_v17 }
 0x9ab   :  { %v829_v37 = vadd.f32 -1.0, %v390_v36 }
 0x9ad   :  { %394 = vrot.lane.b32.xlu1 %v829_v37, %s1117_s7 }
 0xa1f   :  { %v395_v38 = vpop.permute.xlu1 %394 }
 0xa20   :  { %v397_v39 = vmul.f32 %v995_v35, %v395_v38 }
 0xa22   :  { %399 = vrot.lane.b32.xlu1 %v397_v39, %s1124_s1 }
 0xa94   :  { %v400_v41 = vpop.permute.xlu1 %399 }
 0xa95   :  { %v402_v42 = vadd.f32 %v400_v41, %v392_v40 }
 0xa97   :  { %996 = vtanh.f32 %v402_v42 }
 0xaa1   :  { %v997_v43 = vpop.eup %996 }
 0xaa2   :  { %405 = vrot.lane.b32.xlu0 %v997_v43, %s1117_s7 }
 0xaa6   :  { %410 = vperm.xlu0 %966, %v1221_v4  }
 0xaaa   :  { %967 = vset.pattern.permute.xlu0 %v1129_v11 }
 0xb14   :  { %v406_v45 = vpop.permute.xlu0 %405 }
 0xb15   :  { %v408_v46 = vmul.f32 %v995_v35, %v406_v45 }
 0xb17   :  { %v415_v47 = vpack.c.bf16 %v408_v46, %v408_v46 }
 0xb19   :  { %417 = vrot.lane.b32.xlu1 %v415_v47, %s1124_s1 }
 0xb25   :  { %v411_v49 = vpop.permute.xlu0 %410 }
 0xb26   :  { %v413_v50 = vmul.f32 %v1240_v5, %v411_v49 }
 0xb28   :  { %v414_v51 = vadd.f32 %v1246_v8, %v413_v50 }
 0xb8b   :  { %v418_v48 = vpop.permute.xlu1 %417 }
 0xb8c   :  { %910 = vmatmul.mubr.msk.bf16.vlgmr.msra.gmra.mrb[8].mxu0 %vm102_vm1, %v418_v48 }
 0xb8d   :  { %922 = vmatpush3.bf16.msra.mxu0 %v1216_v2  ;;  %925 = vmatprep.mubr.msk.bf16.mxu0 %vm1122_vm0, %v1121_v0 }
 0xb8e   :  { %923 = vmatprep.subr.bf16.mxu0 %v1121_v0 }
 0xb91   :  { %924 = vmatpush3.bf16.msra.mxu0 %v1219_v3 }
 0xb92   :  { %937 = vmatprep.subr.bf16.mxu0 %v1121_v0 }
 0xc5f   :  { %v456_v52 = vpop.f32.mrb[8].mxu0 }
 0xc60   :  { %v462_v53 = vadd.f32 %v456_v52, %v414_v51  ;;  %v911_v54 = vpop.f32.mrb[9].mxu0 }
 0xc61   :  { %v459_v55 = vpop.f32.mrb[10].mxu0 }
 0xc62   :  { %v831_v56 = vmul.f32 -1.442695, %v462_v53  ;;  %v912_v57 = vpop.f32.mrb[11].mxu0 }
 0xc64   :  { %998 = vpow2.f32 %v831_v56 }
 0xc6e   :  { %v999_v58 = vpop.eup %998 }
 0xc6f   :  { %v466_v59 = vadd.f32 1.0, %v999_v58 }
 0xc71   :  { %1000 = vrcp.f32 %v466_v59  ;;  %v1131_v59 = vmov 7  }
 0xc7b   :  { %v1001_v60 = vpop.eup %1000 }
 0xc7c   :  { %v469_v61 = vmul.f32 2.0, %v1001_v60  ;;  %v471_v6 = vmul.f32 %v1001_v60, %v402_v42 }
 0xc7e   :  { %v832_v62 = vadd.f32 -1.0, %v469_v61 }
 0xc80   :  { %473 = vrot.lane.b32.xlu1 %v832_v62, %s1117_s7 }
 0xcf2   :  { %v474_v63 = vpop.permute.xlu1 %473 }
 0xcf3   :  { %v476_v1 = vmul.f32 %v1001_v60, %v474_v63 }
 0xcf5   :  { %478 = vrot.lane.b32.xlu1 %v476_v1, %s1124_s1 }
 0xd67   :  { %v479_v7 = vpop.permute.xlu1 %478 }
 0xd68   :  { %v481_v9 = vadd.f32 %v479_v7, %v471_v6 }
 0xd6a   :  { %1002 = vtanh.f32 %v481_v9 }
 0xd74   :  { %v1003_v10 = vpop.eup %1002 }
 0xd75   :  { %484 = vrot.lane.b32.xlu0 %v1003_v10, %s1117_s7 }
 0xd79   :  { %489 = vperm.xlu0 %967, %v1221_v4  }
 0xd7d   :  { %968 = vset.pattern.permute.xlu0 %v1130_v34 }
 0xde7   :  { %v485_v12 = vpop.permute.xlu0 %484 }
 0xde8   :  { %v487_v13 = vmul.f32 %v1001_v60, %v485_v12 }
 0xdea   :  { %v494_v14 = vpack.c.bf16 %v487_v13, %v487_v13 }
 0xdec   :  { %496 = vrot.lane.b32.xlu1 %v494_v14, %s1124_s1 }
 0xdf8   :  { %v490_v16 = vpop.permute.xlu0 %489 }
 0xdf9   :  { %v492_v17 = vmul.f32 %v1240_v5, %v490_v16 }
 0xdfb   :  { %v493_v18 = vadd.f32 %v1246_v8, %v492_v17 }
 0xe5e   :  { %v497_v15 = vpop.permute.xlu1 %496 }
 0xe5f   :  { %918 = vmatmul.mubr.msk.bf16.vlgmr.msra.gmra.mrb[8].mxu1 %vm102_vm1, %v497_v15 }
 0xe60   :  { %930 = vmatpush3.bf16.msra.mxu1 %v1216_v2  ;;  %933 = vmatprep.mubr.msk.bf16.mxu1 %vm1122_vm0, %v1121_v0 }
 0xe61   :  { %931 = vmatprep.subr.bf16.mxu1 %v1121_v0 }
 0xe64   :  { %932 = vmatpush3.bf16.msra.mxu1 %v1219_v3 }
 0xf32   :  { %v535_v19 = vpop.f32.mrb[8].mxu1 }
 0xf33   :  { %v541_v20 = vadd.f32 %v535_v19, %v493_v18  ;;  %v919_v21 = vpop.f32.mrb[9].mxu1 }
 0xf34   :  { %v538_v22 = vpop.f32.mrb[10].mxu1 }
 0xf35   :  { %v834_v23 = vmul.f32 -1.442695, %v541_v20  ;;  %v920_v24 = vpop.f32.mrb[11].mxu1  ;;  %v972_v22 = vld [vmem:[#allocation7] sm:$0xff]  }
 0xf37   :  { %1004 = vpow2.f32 %v834_v23  ;;  %v973_v23 = vld [vmem:[#allocation7 + $0x8] sm:$0xff]  }
 0xf41   :  { %v1005_v2 = vpop.eup %1004 }
 0xf42   :  { %v545_v25 = vadd.f32 1.0, %v1005_v2 }
 0xf44   :  { %1006 = vrcp.f32 %v545_v25 }
 0xf4e   :  { %v1007_v26 = vpop.eup %1006 }
 0xf4f   :  { %v548_v27 = vmul.f32 2.0, %v1007_v26  ;;  %v550_v30 = vmul.f32 %v1007_v26, %v481_v9 }
 0xf51   :  { %v835_v28 = vadd.f32 -1.0, %v548_v27 }
 0xf53   :  { %552 = vrot.lane.b32.xlu1 %v835_v28, %s1117_s7 }
 0xfc5   :  { %v553_v3 = vpop.permute.xlu1 %552 }
 0xfc6   :  { %v555_v29 = vmul.f32 %v1007_v26, %v553_v3 }
 0xfc8   :  { %557 = vrot.lane.b32.xlu1 %v555_v29, %s1124_s1  ;;  %v842_v29 = vld [vmem:[%s1362_s5] ss:$0 sm:$0xff] }
0x103a   :  { %v558_v31 = vpop.permute.xlu1 %557 }
0x103b   :  { %v560_v32 = vadd.f32 %v558_v31, %v550_v30 }
0x103d   :  { %1008 = vtanh.f32 %v560_v32 }
0x1047   :  { %v1009_v33 = vpop.eup %1008 }
0x1048   :  { %563 = vrot.lane.b32.xlu0 %v1009_v33, %s1117_s7 }
0x104c   :  { %568 = vperm.xlu0 %968, %v1221_v4  }
0x1050   :  { %969 = vset.pattern.permute.xlu0 %v1131_v59 }
0x10ba   :  { %v564_v35 = vpop.permute.xlu0 %563 }
0x10bb   :  { %v566_v36 = vmul.f32 %v1007_v26, %v564_v35 }
0x10bd   :  { %v573_v37 = vpack.c.bf16 %v566_v36, %v566_v36 }
0x10bf   :  { %575 = vrot.lane.b32.xlu1 %v573_v37, %s1124_s1 }
0x10cb   :  { %v569_v39 = vpop.permute.xlu0 %568 }
0x10cc   :  { %v571_v40 = vmul.f32 %v1240_v5, %v569_v39 }
0x10ce   :  { %v572_v41 = vadd.f32 %v1246_v8, %v571_v40 }
0x1131   :  { %v576_v38 = vpop.permute.xlu1 %575 }
0x1132   :  { %926 = vmatmul.mubr.msk.bf16.vlgmr.msra.gmra.mrb[12].mxu0 %vm102_vm1, %v576_v38 }
0x1133   :  { %941 = vmatprep.mubr.msk.bf16.mxu0 %vm1122_vm0, %v1121_v0  ;;  %938 = vmatpush3.bf16.msra.mxu0 %v972_v22 }
0x1134   :  { %939 = vmatprep.subr.bf16.mxu0 %v1121_v0 }
0x1137   :  { %940 = vmatpush3.bf16.msra.mxu0 %v973_v23 }
0x1205   :  { %v614_v42 = vpop.f32.mrb[12].mxu0 }
0x1206   :  { %v620_v43 = vadd.f32 %v614_v42, %v572_v41  ;;  %v927_v44 = vpop.f32.mrb[13].mxu0 }
0x1207   :  { %v617_v45 = vpop.f32.mrb[14].mxu0 }
0x1208   :  { %v837_v46 = vmul.f32 -1.442695, %v620_v43  ;;  %v928_v47 = vpop.f32.mrb[15].mxu0 }
0x120a   :  { %1010 = vpow2.f32 %v837_v46 }
0x1214   :  { %v1011_v48 = vpop.eup %1010 }
0x1215   :  { %v624_v49 = vadd.f32 1.0, %v1011_v48 }
0x1217   :  { %1012 = vrcp.f32 %v624_v49 }
0x1221   :  { %v1013_v50 = vpop.eup %1012 }
0x1222   :  { %v627_v51 = vmul.f32 2.0, %v1013_v50  ;;  %v629_v55 = vmul.f32 %v1013_v50, %v560_v32 }
0x1224   :  { %v838_v52 = vadd.f32 -1.0, %v627_v51 }
0x1226   :  { %631 = vrot.lane.b32.xlu1 %v838_v52, %s1117_s7 }
0x1298   :  { %v632_v53 = vpop.permute.xlu1 %631 }
0x1299   :  { %v634_v54 = vmul.f32 %v1013_v50, %v632_v53 }
0x129b   :  { %636 = vrot.lane.b32.xlu1 %v634_v54, %s1124_s1 }
0x130d   :  { %v637_v56 = vpop.permute.xlu1 %636 }
0x130e   :  { %v639_v57 = vadd.f32 %v637_v56, %v629_v55 }
0x1310   :  { %1014 = vtanh.f32 %v639_v57 }
0x131a   :  { %v1015_v58 = vpop.eup %1014 }
0x131b   :  { %642 = vrot.lane.b32.xlu0 %v1015_v58, %s1117_s7 }
0x131f   :  { %647 = vperm.xlu0 %969, %v1221_v4  }
0x138d   :  { %v643_v60 = vpop.permute.xlu0 %642 }
0x138e   :  { %v645_v61 = vmul.f32 %v1013_v50, %v643_v60 }
0x1390   :  { %v652_v62 = vpack.c.bf16 %v645_v61, %v645_v61 }
0x1392   :  { %654 = vrot.lane.b32.xlu1 %v652_v62, %s1124_s1 }
0x139e   :  { %v648_v1 = vpop.permute.xlu0 %647 }
0x139f   :  { %v650_v6 = vmul.f32 %v1240_v5, %v648_v1 }
0x13a1   :  { %v651_v7 = vadd.f32 %v1246_v8, %v650_v6 }
0x1404   :  { %v655_v63 = vpop.permute.xlu1 %654 }
0x1405   :  { %934 = vmatmul.mubr.msk.bf16.vlgmr.msra.gmra.mrb[12].mxu1 %vm102_vm1, %v655_v63 }
0x14d8   :  { %v693_v9 = vpop.f32.mrb[12].mxu1 }
0x14d9   :  { %v699_v10 = vadd.f32 %v693_v9, %v651_v7  ;;  %v935_v11 = vpop.f32.mrb[13].mxu1 }
0x14da   :  { %v696_v12 = vpop.f32.mrb[14].mxu1 }
0x14db   :  { %v840_v13 = vmul.f32 -1.442695, %v699_v10  ;;  %v936_v14 = vpop.f32.mrb[15].mxu1 }
0x14dd   :  { %1016 = vpow2.f32 %v840_v13 }
0x14e7   :  { %v1017_v4 = vpop.eup %1016 }
0x14e8   :  { %v703_v15 = vadd.f32 1.0, %v1017_v4 }
0x14ea   :  { %1018 = vrcp.f32 %v703_v15 }
0x14f4   :  { %v1019_v16 = vpop.eup %1018 }
0x14f5   :  { %v706_v17 = vmul.f32 2.0, %v1019_v16  ;;  %v708_v5 = vmul.f32 %v1019_v16, %v639_v57 }
0x14f7   :  { %v841_v18 = vadd.f32 -1.0, %v706_v17 }
0x14f9   :  { %710 = vrot.lane.b32.xlu1 %v841_v18, %s1117_s7 }
0x156b   :  { %v711_v19 = vpop.permute.xlu1 %710 }
0x156c   :  { %v713_v20 = vmul.f32 %v1019_v16, %v711_v19 }
0x156e   :  { %715 = vrot.lane.b32.xlu1 %v713_v20, %s1124_s1 }
0x15e0   :  { %v716_v8 = vpop.permute.xlu1 %715 }
0x15e1   :  { %v718_v21 = vadd.f32 %v716_v8, %v708_v5 }
0x15e3   :  { %1020 = vtanh.f32 %v718_v21 }
0x15ed   :  { %v1021_v24 = vpop.eup %1020 }
0x15ee   :  { %721 = vrot.lane.b32.xlu0 %v1021_v24, %s1117_s7  ;;  %s1088_s7 = scalar_lea.vmem %s806_s15, 128 }
0x15ef   :  { %p1089_p10 = scmp.ne.s32.totalorder %s806_s15, %s1088_s7  ;;  %p1094_p12 = scmp.lt.s32.totalorder %s1088_s7, %s1088_s7 }
0x15f1   :  { %p1095_p13 = por %p1094_p12, %p1093_p11 }
0x15f3   :  { %p1096_p0 = pnand %p1095_p13, %p1089_p10 }
0x1660   :  { %v722_v2 = vpop.permute.xlu0 %721 }
0x1661   :  { %v724_v25 = vmul.f32 %v1019_v16, %v722_v2 }
0x1663   :  { %vm725_vm2 = vcmp.gt.f32.partialorder %v724_v25, 0.0  ;;  %v726_v26 = vmul.f32 0.01, %v724_v25 }
0x1665   :  { %v727_v27 = vsel %vm725_vm2, %v724_v25, %v726_v26 }
0x1666   :  { %v728_v28 = vpack.c.bf16 %v727_v27, %v727_v27 }
0x1668   :  { %741 = vrot.lane.b32.xlu1 %v728_v28, %s1124_s1 }
0x16da   :  { %v742_v3 = vpop.permute.xlu1 %741 }
0x16db   :  { %942 = vmatmul.mubr.msk.bf16.vlgmr.msra.gmra.mrb[16].mxu0 %vm102_vm1, %v742_v3 }
0x17ae   :  { %v792_v0 = vpop.f32.mrb[16].mxu0 }
0x17af   :  { %v793_v30 = vadd.f32 %v842_v29, %v792_v0  ;;  %v943_v31 = vpop.f32.mrb[17].mxu0 }
0x17b0   :  { %v795_v32 = vpop.f32.mrb[18].mxu0 }
0x17b1   :  { %798 = vst [vmem:[#allocation8] sm:$0xff] %v793_v30  ;;  %v944_v33 = vpop.f32.mrb[19].mxu0 }
0x17b2   :  { %1099 = shalt.err (!%p1096_p0)
}
0x17b3   :  { %s1100_s5 = scalar_lea.hbm %s1363_s6, 128 }
0x17b4   :  { %p1101_p1 = scmp.ne.s32.totalorder %s1363_s6, %s1100_s5  ;;  %p1104_p2 = scmp.lt.u32.totalorder %s1100_s5, %s1363_s6 }
0x17b6   :  { %p1106_p3 = pnand %p1104_p2, %p1101_p1 }
0x17b8   :  { %1109 = shalt.err (!%p1106_p3)
}
0x17b9   :  { %808 = dma.vmem_to_hbm [thread:$0]  %s806_s15, 128, %s1363_s6, [#allocation4]  }
0x17ba   :  { %1114 = dma.done.wait [#allocation4], 128  }
0x17bb   :  { %1115 = vsyncadd [#allocation4], 4294967168 }
0x17bc   :  { %812 = vsyncpa [#allocation3], 1 }
0x17bd   :  { %813 = vsyncpa [#allocation6], 1 }
0x17be   :  { %814 = vsyncpa [#allocation4], 1 }

</bundles_post_ra>
